<compile_context>
chip_gen: v5e
topology: v5e:2x2
jax: 0.10.0
libtpu: 0.0.40
codegen_flags: <defaults>
</compile_context>

<pallas_src>
import functools

import jax
import jax.numpy as jnp
from jax.experimental import pallas as pl
from jax.experimental.pallas import tpu as pltpu


def _clip_loss_kernel(scale_ref, img_ref, txt_ref,
                      row_ref, col_ref, diag_ref,
                      m_r, l_r, m_c, l_c, diag_sc):
    i = pl.program_id(0)            # row-tile index (image rows)
    j = pl.program_id(1)            # column-tile index (text rows), fastest axis
    ni = pl.num_programs(0)
    nj = pl.num_programs(1)

    scale = scale_ref[0]            # f32 (exp'd) temperature, from SMEM

    a = img_ref[...]                # (T, D) native dtype (bf16/f32) -> MXU as-is
    b = txt_ref[...]                # (T, D) native dtype

    # (T, T) tile of logits = scale * img @ txt.T.  dot_general contracts the
    # last dim of both operands (no transpose of the text tile) and accumulates
    # in f32.  `scale` is applied once to the resident f32 tile; scaling an
    # operand instead would be redone every time that feature tile is revisited.
    logits = scale * jax.lax.dot_general(
        a, b, dimension_numbers=(((1,), (1,)), ((), ())),
        preferred_element_type=jnp.float32)

    # ---------------- image -> text : online row-wise logsumexp ----------------
    @pl.when(j == 0)
    def _():
        m_r[...] = jnp.full(m_r.shape, -jnp.inf, jnp.float32)
        l_r[...] = jnp.zeros(l_r.shape, jnp.float32)

    m_new = jnp.maximum(m_r[...], jnp.max(logits, axis=1, keepdims=True))
    l_r[...] = (l_r[...] * jnp.exp(m_r[...] - m_new)
                + jnp.sum(jnp.exp(logits - m_new), axis=1, keepdims=True))
    m_r[...] = m_new

    # ---------------- text -> image : online column-wise logsumexp -------------
    # Slot j of the (nj, 1, T) accumulators persists across row tiles.
    @pl.when((i == 0) & (j == 0))
    def _():
        m_c[...] = jnp.full(m_c.shape, -jnp.inf, jnp.float32)
        l_c[...] = jnp.zeros(l_c.shape, jnp.float32)

    mc = m_c[j]                                               # (1, T)
    mc_new = jnp.maximum(mc, jnp.max(logits, axis=0, keepdims=True))
    l_c[j] = (l_c[j] * jnp.exp(mc - mc_new)
              + jnp.sum(jnp.exp(logits - mc_new), axis=0, keepdims=True))
    m_c[j] = mc_new

    # ---------- diagonal targets (labels == arange): only on i == j tiles ------
    @pl.when(i == j)
    def _():
        d = scale * jnp.sum(a.astype(jnp.float32) * b.astype(jnp.float32),
                            axis=1, keepdims=True)            # (T, 1), f32 accum
        diag_sc[...] = d
        diag_ref[...] = d

    # ---------- finalize per-row partial loss after the last column tile -------
    @pl.when(j == nj - 1)
    def _():
        row_ref[...] = m_r[...] + jnp.log(l_r[...]) - diag_sc[...]

    # ---------- finalize per-column logsumexp at the very last grid step -------
    @pl.when((i == ni - 1) & (j == nj - 1))
    def _():
        col_ref[...] = m_c[...] + jnp.log(l_c[...])


def _pick_tile(n, max_tile, min_tile):
    """Largest power-of-two-ish tile <= max_tile that divides n, else n (full)."""
    t = min(max_tile, n)
    while t >= min_tile:
        if n % t == 0:
            return t
        t //= 2
    return n


@functools.partial(jax.jit, static_argnames=("block",))
def clip_loss(image_features, text_features, logit_scale, *, block=256):
    """0.5 * (CE(s*img@txt.T, arange(N)) + CE(s*txt@img.T, arange(N)))."""
    N, D = image_features.shape
    assert text_features.shape == (N, D)
    # Square tiles so the label diagonal lives entirely on i == j tiles.
    min_tile = max(8, 32 // jnp.dtype(image_features.dtype).itemsize)
    T = _pick_tile(N, block, min_tile)
    ni = nj = N // T

    scale = jnp.asarray(logit_scale, jnp.float32).reshape(1)

    row_partial, col_lse, diag = pl.pallas_call(
        _clip_loss_kernel,
        grid=(ni, nj),
        in_specs=[
            pl.BlockSpec(memory_space=pltpu.SMEM),            # logit_scale (f32)
            pl.BlockSpec((T, D), lambda i, j: (i, 0)),        # image feature tile
            pl.BlockSpec((T, D), lambda i, j: (j, 0)),        # text feature tile
        ],
        out_specs=(
            pl.BlockSpec((T, 1), lambda i, j: (i, 0)),        # lse_row - diag
            pl.BlockSpec((nj, 1, T), lambda i, j: (0, 0, 0)),  # lse_col
            pl.BlockSpec((T, 1), lambda i, j: (i, 0)),        # diag (targets)
        ),
        out_shape=(
            jax.ShapeDtypeStruct((N, 1), jnp.float32),
            jax.ShapeDtypeStruct((nj, 1, T), jnp.float32),
            jax.ShapeDtypeStruct((N, 1), jnp.float32),
        ),
        scratch_shapes=[
            pltpu.VMEM((T, 1), jnp.float32),                  # m_r
            pltpu.VMEM((T, 1), jnp.float32),                  # l_r
            pltpu.VMEM((nj, 1, T), jnp.float32),              # m_c (per col tile)
            pltpu.VMEM((nj, 1, T), jnp.float32),              # l_c (per col tile)
            pltpu.VMEM((T, 1), jnp.float32),                  # diag scratch
        ],
        compiler_params=pltpu.CompilerParams(
            # Row accumulators carry state across j, column accumulators across
            # i, so neither grid axis may be megacore-split.
            # TODO(synk): per-core column partials + a tiny combine epilogue to
            # use both v7x TensorCores on the row-tile axis.
            dimension_semantics=("arbitrary", "arbitrary"),
            vmem_limit_bytes=32 * 1024 * 1024,
        ),
    )(scale, image_features, text_features)

    loss_img = jnp.mean(row_partial)                           # mean_i(lse_r - diag)
    loss_txt = jnp.mean(col_lse.reshape(N) - diag.reshape(N))  # mean_j(lse_c - diag)
    return 0.5 * (loss_img + loss_txt)


def clip_loss_ref(image_features, text_features, logit_scale):
    """Pure-JAX reference mirroring the PyTorch module (world_size=1)."""
    img = image_features.astype(jnp.float32)
    txt = text_features.astype(jnp.float32)
    logits = logit_scale * img @ txt.T
    n = logits.shape[0]
    labels = jnp.arange(n)

    def ce(lg):
        lse = jax.scipy.special.logsumexp(lg, axis=1)
        return jnp.mean(lse - lg[jnp.arange(n), labels])

    return 0.5 * (ce(logits) + ce(logits.T))


if __name__ == "__main__":
    key = jax.random.PRNGKey(0)
    k_img, k_txt = jax.random.split(key)

    # Small CLIP-like problem: 16 image/text pairs, feature dim 32.
    N, D = 16, 32
    img = jax.random.normal(k_img, (N, D), dtype=jnp.float32)
    txt = jax.random.normal(k_txt, (N, D), dtype=jnp.float32)
    img = img / jnp.linalg.norm(img, axis=-1, keepdims=True)
    txt = txt / jnp.linalg.norm(txt, axis=-1, keepdims=True)
    # Round features to bf16-representable values so the f32 and bf16 MXU paths
    # agree to f32 accuracy regardless of the backend's default matmul precision.
    img = img.astype(jnp.bfloat16).astype(jnp.float32)
    txt = txt.astype(jnp.bfloat16).astype(jnp.float32)
    logit_scale = jnp.float32(14.285714)  # deterministic "exp(learned temp)"

    ref = clip_loss_ref(img, txt, logit_scale)

    # Multi-tile path: 8x8 logits tiles -> 2x2 grid exercises the online row /
    # column logsumexp accumulators and the diagonal-tile handling.
    loss_tiled = jax.block_until_ready(clip_loss(img, txt, logit_scale, block=8))
    assert jnp.allclose(loss_tiled, ref, rtol=1e-4, atol=1e-4), (loss_tiled, ref)

    # Single-tile path with native bf16 features fed straight to the MXU.
    loss_bf16 = jax.block_until_ready(
        clip_loss(img.astype(jnp.bfloat16), txt.astype(jnp.bfloat16), logit_scale))
    assert jnp.allclose(loss_bf16, ref, rtol=1e-4, atol=1e-4), (loss_bf16, ref)

    print("KERNEL_OK")
</pallas_src>

<mosaic_0001>
module attributes {stable_mosaic.version = 11 : i64} {
  func.func @_clip_loss_kernel(%arg0: i32, %arg1: i32, %arg2: memref<1xf32, #tpu.memory_space<smem>>, %arg3: memref<8x32xf32, #tpu.memory_space<vmem>>, %arg4: memref<8x32xf32, #tpu.memory_space<vmem>>, %arg5: memref<8x1xf32, #tpu.memory_space<vmem>>, %arg6: memref<2x1x8xf32, #tpu.memory_space<vmem>>, %arg7: memref<8x1xf32, #tpu.memory_space<vmem>>, %arg8: memref<8x1xf32, #tpu.memory_space<vmem>>, %arg9: memref<8x1xf32, #tpu.memory_space<vmem>>, %arg10: memref<2x1x8xf32, #tpu.memory_space<vmem>>, %arg11: memref<2x1x8xf32, #tpu.memory_space<vmem>>, %arg12: memref<8x1xf32, #tpu.memory_space<vmem>>) attributes {dimension_semantics = [#tpu.dimension_semantics<arbitrary>, #tpu.dimension_semantics<arbitrary>], iteration_bounds = array<i64: 2, 2>, scalar_prefetch = 0 : i64, scratch_operands = 5 : i64, tpu.core_type = #tpu.core_type<tc>, window_params = [{transform_indices = @transform_0, window_bounds = array<i64: 1>}, {transform_indices = @transform_1, window_bounds = array<i64: 8, 32>}, {transform_indices = @transform_2, window_bounds = array<i64: 8, 32>}, {transform_indices = @transform_3, window_bounds = array<i64: 8, 1>}, {pipeline_mode = #tpu.pipeline_mode<synchronous>, transform_indices = @transform_4, window_bounds = array<i64: 2, 1, 8>}, {transform_indices = @transform_5, window_bounds = array<i64: 8, 1>}]} {
    %c0 = arith.constant 0 : index
    %0 = memref.load %arg2[%c0] : memref<1xf32, #tpu.memory_space<smem>>
    %c0_0 = arith.constant 0 : index
    %c0_1 = arith.constant 0 : index
    %1 = vector.load %arg3[%c0_0, %c0_1] : memref<8x32xf32, #tpu.memory_space<vmem>>, vector<8x32xf32>
    %c0_2 = arith.constant 0 : index
    %c0_3 = arith.constant 0 : index
    %2 = vector.load %arg4[%c0_2, %c0_3] : memref<8x32xf32, #tpu.memory_space<vmem>>, vector<8x32xf32>
    %cst = arith.constant dense<0.000000e+00> : vector<8x8xf32>
    %3 = tpu.matmul %1, %2, %cst {dimension_numbers = #tpu.dot_dimension_numbers<[1], [1], [0], [0], [0, 0, 1, 0], [], []>} : vector<8x32xf32>, vector<8x32xf32>, vector<8x8xf32> -> vector<8x8xf32>
    %4 = vector.broadcast %0 : f32 to vector<8x8xf32>
    %5 = arith.mulf %4, %3 : vector<8x8xf32>
    %c0_i32 = arith.constant 0 : i32
    %6 = arith.cmpi eq, %arg1, %c0_i32 : i32
    %7 = arith.extui %6 : i1 to i32
    %c0_i32_4 = arith.constant 0 : i32
    %8 = arith.cmpi ne, %7, %c0_i32_4 : i32
    scf.if %8 {
      %cst_35 = arith.constant 0xFF800000 : f32
      %68 = vector.broadcast %cst_35 : f32 to vector<8x1xf32>
      %c0_36 = arith.constant 0 : index
      %c0_37 = arith.constant 0 : index
      %69 = vector.load %arg8[%c0_36, %c0_37] : memref<8x1xf32, #tpu.memory_space<vmem>>, vector<8x1xf32>
      tpu.vector_store %arg8[%c0_36, %c0_37], %68 {strides = array<i32>} : memref<8x1xf32, #tpu.memory_space<vmem>>, vector<8x1xf32>,
      %cst_38 = arith.constant 0.000000e+00 : f32
      %70 = vector.broadcast %cst_38 : f32 to vector<8x1xf32>
      %c0_39 = arith.constant 0 : index
      %c0_40 = arith.constant 0 : index
      %71 = vector.load %arg9[%c0_39, %c0_40] : memref<8x1xf32, #tpu.memory_space<vmem>>, vector<8x1xf32>
      tpu.vector_store %arg9[%c0_39, %c0_40], %70 {strides = array<i32>} : memref<8x1xf32, #tpu.memory_space<vmem>>, vector<8x1xf32>,
    } else {
    }
    %c0_5 = arith.constant 0 : index
    %c0_6 = arith.constant 0 : index
    %9 = vector.load %arg8[%c0_5, %c0_6] : memref<8x1xf32, #tpu.memory_space<vmem>>, vector<8x1xf32>
    %cst_7 = arith.constant dense<0xFF800000> : vector<8xf32>
    %10 = vector.multi_reduction <maximumf>, %5, %cst_7 [1] : vector<8x8xf32> to vector<8xf32>
    %11 = vector.shape_cast %10 : vector<8xf32> to vector<8x1xf32>
    %12 = arith.maximumf %9, %11 : vector<8x1xf32>
    %c0_8 = arith.constant 0 : index
    %c0_9 = arith.constant 0 : index
    %13 = vector.load %arg9[%c0_8, %c0_9] : memref<8x1xf32, #tpu.memory_space<vmem>>, vector<8x1xf32>
    %c0_10 = arith.constant 0 : index
    %c0_11 = arith.constant 0 : index
    %14 = vector.load %arg8[%c0_10, %c0_11] : memref<8x1xf32, #tpu.memory_space<vmem>>, vector<8x1xf32>
    %15 = arith.subf %14, %12 : vector<8x1xf32>
    %16 = math.exp %15 : vector<8x1xf32>
    %17 = arith.mulf %13, %16 : vector<8x1xf32>
    %18 = vector.broadcast %12 : vector<8x1xf32> to vector<8x8xf32>
    %19 = arith.subf %5, %18 : vector<8x8xf32>
    %20 = math.exp %19 : vector<8x8xf32>
    %cst_12 = arith.constant dense<0.000000e+00> : vector<8xf32>
    %21 = vector.multi_reduction <add>, %20, %cst_12 [1] : vector<8x8xf32> to vector<8xf32>
    %22 = vector.shape_cast %21 : vector<8xf32> to vector<8x1xf32>
    %23 = arith.addf %17, %22 : vector<8x1xf32>
    %c0_13 = arith.constant 0 : index
    %c0_14 = arith.constant 0 : index
    %24 = vector.load %arg9[%c0_13, %c0_14] : memref<8x1xf32, #tpu.memory_space<vmem>>, vector<8x1xf32>
    tpu.vector_store %arg9[%c0_13, %c0_14], %23 {strides = array<i32>} : memref<8x1xf32, #tpu.memory_space<vmem>>, vector<8x1xf32>,
    %c0_15 = arith.constant 0 : index
    %c0_16 = arith.constant 0 : index
    %25 = vector.load %arg8[%c0_15, %c0_16] : memref<8x1xf32, #tpu.memory_space<vmem>>, vector<8x1xf32>
    tpu.vector_store %arg8[%c0_15, %c0_16], %12 {strides = array<i32>} : memref<8x1xf32, #tpu.memory_space<vmem>>, vector<8x1xf32>,
    %c0_i32_17 = arith.constant 0 : i32
    %26 = arith.cmpi eq, %arg0, %c0_i32_17 : i32
    %c0_i32_18 = arith.constant 0 : i32
    %27 = arith.cmpi eq, %arg1, %c0_i32_18 : i32
    %28 = arith.andi %26, %27 : i1
    %29 = arith.extui %28 : i1 to i32
    %c0_i32_19 = arith.constant 0 : i32
    %30 = arith.cmpi ne, %29, %c0_i32_19 : i32
    scf.if %30 {
      %cst_35 = arith.constant 0xFF800000 : f32
      %68 = vector.broadcast %cst_35 : f32 to vector<2x1x8xf32>
      %c0_36 = arith.constant 0 : index
      %c0_37 = arith.constant 0 : index
      %c0_38 = arith.constant 0 : index
      %69 = vector.load %arg10[%c0_36, %c0_37, %c0_38] : memref<2x1x8xf32, #tpu.memory_space<vmem>>, vector<2x1x8xf32>
      tpu.vector_store %arg10[%c0_36, %c0_37, %c0_38], %68 {strides = array<i32>} : memref<2x1x8xf32, #tpu.memory_space<vmem>>, vector<2x1x8xf32>,
      %cst_39 = arith.constant 0.000000e+00 : f32
      %70 = vector.broadcast %cst_39 : f32 to vector<2x1x8xf32>
      %c0_40 = arith.constant 0 : index
      %c0_41 = arith.constant 0 : index
      %c0_42 = arith.constant 0 : index
      %71 = vector.load %arg11[%c0_40, %c0_41, %c0_42] : memref<2x1x8xf32, #tpu.memory_space<vmem>>, vector<2x1x8xf32>
      tpu.vector_store %arg11[%c0_40, %c0_41, %c0_42], %70 {strides = array<i32>} : memref<2x1x8xf32, #tpu.memory_space<vmem>>, vector<2x1x8xf32>,
    } else {
    }
    %31 = arith.index_cast %arg1 : i32 to index
    %c0_20 = arith.constant 0 : index
    %c0_21 = arith.constant 0 : index
    %32 = vector.load %arg10[%31, %c0_20, %c0_21] : memref<2x1x8xf32, #tpu.memory_space<vmem>>, vector<1x1x8xf32>
    %33 = vector.shape_cast %32 : vector<1x1x8xf32> to vector<1x8xf32>
    %cst_22 = arith.constant dense<0xFF800000> : vector<8xf32>
    %34 = vector.multi_reduction <maximumf>, %5, %cst_22 [0] : vector<8x8xf32> to vector<8xf32>
    %35 = vector.shape_cast %34 : vector<8xf32> to vector<1x8xf32>
    %36 = arith.maximumf %33, %35 : vector<1x8xf32>
    %37 = arith.index_cast %arg1 : i32 to index
    %c0_23 = arith.constant 0 : index
    %c0_24 = arith.constant 0 : index
    %38 = vector.load %arg11[%37, %c0_23, %c0_24] : memref<2x1x8xf32, #tpu.memory_space<vmem>>, vector<1x1x8xf32>
    %39 = vector.shape_cast %38 : vector<1x1x8xf32> to vector<1x8xf32>
    %40 = arith.subf %33, %36 : vector<1x8xf32>
    %41 = math.exp %40 : vector<1x8xf32>
    %42 = arith.mulf %39, %41 : vector<1x8xf32>
    %43 = vector.broadcast %36 : vector<1x8xf32> to vector<8x8xf32>
    %44 = arith.subf %5, %43 : vector<8x8xf32>
    %45 = math.exp %44 : vector<8x8xf32>
    %cst_25 = arith.constant dense<0.000000e+00> : vector<8xf32>
    %46 = vector.multi_reduction <add>, %45, %cst_25 [0] : vector<8x8xf32> to vector<8xf32>
    %47 = vector.shape_cast %46 : vector<8xf32> to vector<1x8xf32>
    %48 = arith.addf %42, %47 : vector<1x8xf32>
    %49 = arith.index_cast %arg1 : i32 to index
    %c0_26 = arith.constant 0 : index
    %c0_27 = arith.constant 0 : index
    %50 = vector.load %arg11[%49, %c0_26, %c0_27] : memref<2x1x8xf32, #tpu.memory_space<vmem>>, vector<1x1x8xf32>
    %51 = vector.shape_cast %50 : vector<1x1x8xf32> to vector<1x8xf32>
    %52 = vector.shape_cast %48 : vector<1x8xf32> to vector<1x1x8xf32>
    tpu.vector_store %arg11[%49, %c0_26, %c0_27], %52 {strides = array<i32>} : memref<2x1x8xf32, #tpu.memory_space<vmem>>, vector<1x1x8xf32>,
    %53 = arith.index_cast %arg1 : i32 to index
    %c0_28 = arith.constant 0 : index
    %c0_29 = arith.constant 0 : index
    %54 = vector.load %arg10[%53, %c0_28, %c0_29] : memref<2x1x8xf32, #tpu.memory_space<vmem>>, vector<1x1x8xf32>
    %55 = vector.shape_cast %54 : vector<1x1x8xf32> to vector<1x8xf32>
    %56 = vector.shape_cast %36 : vector<1x8xf32> to vector<1x1x8xf32>
    tpu.vector_store %arg10[%53, %c0_28, %c0_29], %56 {strides = array<i32>} : memref<2x1x8xf32, #tpu.memory_space<vmem>>, vector<1x1x8xf32>,
    %57 = arith.cmpi eq, %arg0, %arg1 : i32
    %58 = arith.extui %57 : i1 to i32
    %c0_i32_30 = arith.constant 0 : i32
    %59 = arith.cmpi ne, %58, %c0_i32_30 : i32
    scf.if %59 {
      %68 = arith.mulf %1, %2 : vector<8x32xf32>
      %cst_35 = arith.constant dense<0.000000e+00> : vector<8xf32>
      %69 = vector.multi_reduction <add>, %68, %cst_35 [1] : vector<8x32xf32> to vector<8xf32>
      %70 = vector.shape_cast %69 : vector<8xf32> to vector<8x1xf32>
      %71 = vector.broadcast %0 : f32 to vector<8x1xf32>
      %72 = arith.mulf %71, %70 : vector<8x1xf32>
      %c0_36 = arith.constant 0 : index
      %c0_37 = arith.constant 0 : index
      %73 = vector.load %arg12[%c0_36, %c0_37] : memref<8x1xf32, #tpu.memory_space<vmem>>, vector<8x1xf32>
      tpu.vector_store %arg12[%c0_36, %c0_37], %72 {strides = array<i32>} : memref<8x1xf32, #tpu.memory_space<vmem>>, vector<8x1xf32>,
      %c0_38 = arith.constant 0 : index
      %c0_39 = arith.constant 0 : index
      %74 = vector.load %arg7[%c0_38, %c0_39] : memref<8x1xf32, #tpu.memory_space<vmem>>, vector<8x1xf32>
      tpu.vector_store %arg7[%c0_38, %c0_39], %72 {strides = array<i32>} : memref<8x1xf32, #tpu.memory_space<vmem>>, vector<8x1xf32>,
    } else {
    }
    %c1_i32 = arith.constant 1 : i32
    %60 = arith.cmpi eq, %arg1, %c1_i32 : i32
    %61 = arith.extui %60 : i1 to i32
    %c0_i32_31 = arith.constant 0 : i32
    %62 = arith.cmpi ne, %61, %c0_i32_31 : i32
    scf.if %62 {
      %c0_35 = arith.constant 0 : index
      %c0_36 = arith.constant 0 : index
      %68 = vector.load %arg8[%c0_35, %c0_36] : memref<8x1xf32, #tpu.memory_space<vmem>>, vector<8x1xf32>
      %c0_37 = arith.constant 0 : index
      %c0_38 = arith.constant 0 : index
      %69 = vector.load %arg9[%c0_37, %c0_38] : memref<8x1xf32, #tpu.memory_space<vmem>>, vector<8x1xf32>
      %70 = math.log %69 : vector<8x1xf32>
      %71 = arith.addf %68, %70 : vector<8x1xf32>
      %c0_39 = arith.constant 0 : index
      %c0_40 = arith.constant 0 : index
      %72 = vector.load %arg12[%c0_39, %c0_40] : memref<8x1xf32, #tpu.memory_space<vmem>>, vector<8x1xf32>
      %73 = arith.subf %71, %72 : vector<8x1xf32>
      %c0_41 = arith.constant 0 : index
      %c0_42 = arith.constant 0 : index
      %74 = vector.load %arg5[%c0_41, %c0_42] : memref<8x1xf32, #tpu.memory_space<vmem>>, vector<8x1xf32>
      tpu.vector_store %arg5[%c0_41, %c0_42], %73 {strides = array<i32>} : memref<8x1xf32, #tpu.memory_space<vmem>>, vector<8x1xf32>,
    } else {
    }
    %c1_i32_32 = arith.constant 1 : i32
    %63 = arith.cmpi eq, %arg0, %c1_i32_32 : i32
    %c1_i32_33 = arith.constant 1 : i32
    %64 = arith.cmpi eq, %arg1, %c1_i32_33 : i32
    %65 = arith.andi %63, %64 : i1
    %66 = arith.extui %65 : i1 to i32
    %c0_i32_34 = arith.constant 0 : i32
    %67 = arith.cmpi ne, %66, %c0_i32_34 : i32
    scf.if %67 {
      %c0_35 = arith.constant 0 : index
      %c0_36 = arith.constant 0 : index
      %c0_37 = arith.constant 0 : index
      %68 = vector.load %arg10[%c0_35, %c0_36, %c0_37] : memref<2x1x8xf32, #tpu.memory_space<vmem>>, vector<2x1x8xf32>
      %c0_38 = arith.constant 0 : index
      %c0_39 = arith.constant 0 : index
      %c0_40 = arith.constant 0 : index
      %69 = vector.load %arg11[%c0_38, %c0_39, %c0_40] : memref<2x1x8xf32, #tpu.memory_space<vmem>>, vector<2x1x8xf32>
      %70 = math.log %69 : vector<2x1x8xf32>
      %71 = arith.addf %68, %70 : vector<2x1x8xf32>
      %c0_41 = arith.constant 0 : index
      %c0_42 = arith.constant 0 : index
      %c0_43 = arith.constant 0 : index
      %72 = vector.load %arg6[%c0_41, %c0_42, %c0_43] : memref<2x1x8xf32, #tpu.memory_space<vmem>>, vector<2x1x8xf32>
      tpu.vector_store %arg6[%c0_41, %c0_42, %c0_43], %71 {strides = array<i32>} : memref<2x1x8xf32, #tpu.memory_space<vmem>>, vector<2x1x8xf32>,
    } else {
    }
    return
  }
  func.func @transform_0(%arg0: i32, %arg1: i32) -> i32 {
    %c0_i32 = arith.constant 0 : i32
    %c0_i32_0 = arith.constant 0 : i32
    return %c0_i32 : i32
  }
  func.func @transform_1(%arg0: i32, %arg1: i32) -> (i32, i32) {
    %c0_i32 = arith.constant 0 : i32
    %c0_i32_0 = arith.constant 0 : i32
    return %arg0, %c0_i32 : i32, i32
  }
  func.func @transform_2(%arg0: i32, %arg1: i32) -> (i32, i32) {
    %c0_i32 = arith.constant 0 : i32
    %c0_i32_0 = arith.constant 0 : i32
    return %arg1, %c0_i32 : i32, i32
  }
  func.func @transform_3(%arg0: i32, %arg1: i32) -> (i32, i32) {
    %c0_i32 = arith.constant 0 : i32
    %c0_i32_0 = arith.constant 0 : i32
    return %arg0, %c0_i32 : i32, i32
  }
  func.func @transform_4(%arg0: i32, %arg1: i32) -> (i32, i32, i32) {
    %c0_i32 = arith.constant 0 : i32
    %c0_i32_0 = arith.constant 0 : i32
    %c0_i32_1 = arith.constant 0 : i32
    %c0_i32_2 = arith.constant 0 : i32
    return %c0_i32, %c0_i32_0, %c0_i32_1 : i32, i32, i32
  }
  func.func @transform_5(%arg0: i32, %arg1: i32) -> (i32, i32) {
    %c0_i32 = arith.constant 0 : i32
    %c0_i32_0 = arith.constant 0 : i32
    return %arg0, %c0_i32 : i32, i32
  }
}

</mosaic_0001>

<bundles_post_ra>
// kernel: clip_loss.1
= control target key start
LH: loop header
LB: loop body
LE: loop exit
PB: predicated region body
PF: predicated region fallthrough
CT: control target
= control target key end

     0   :  { %s1162_s0 = inlined_call_operand.<no memory space> [shape: f32[1], index: 0, kind: input, shape index: {}]   ;;  %s1163_s1 = inlined_call_operand.hbm [shape: f32[16,32], index: 1, kind: input, shape index: {}]   ;;  %s1164_s2 = inlined_call_operand.hbm [shape: f32[16,32], index: 2, kind: input, shape index: {}]   ;;  %s1165_s3 = inlined_call_operand.vmem [shape: f32[16,1], index: 3, kind: output, shape index: {0}]   ;;  %s1166_s4 = inlined_call_operand.vmem [shape: f32[2,1,8], index: 4, kind: output, shape index: {1}]   ;;  %s1167_s5 = inlined_call_operand.vmem [shape: f32[16,1], index: 5, kind: output, shape index: {2}]  }
   0x1   :  { %1170 = sst [smem:[#allocation15_spill]] %s1163_s1 }
   0x2   :  { %1171 = sst [smem:[#allocation16_spill]] %s1166_s4 }
   0x3   :  { %11 = sst [smem:[#allocation7]] %s1162_s0 }
   0x4   :  { %12 = vsyncpa [#allocation9], 0 }
   0x5   :  { %14 = vsyncpa [#allocation9 + $0x1], 0 }
   0x6   :  { %15 = vsyncpa [#allocation11], 0 }
   0x7   :  { %17 = vsyncpa [#allocation11 + $0x1], 0  ;;  %s921_s20 = smov 0   ;;  %s923_s21 = smov 0  }
   0x8   :  { %s925_s22 = smov 0   ;;  %s927_s23 = smov 0  }
   0x9   :  { %s929_s24 = smov 0   ;;  %s931_s25 = smov 0  }
   0xa   :  { %s933_s26 = smov 0   ;;  %s935_s27 = smov 0  }
   0xb   :  { %s937_s0 = smov 0   ;;  %s939_s28 = smov 0  }
   0xc   :  { %s941_s29 = smov 0  }
   0xd LB: > { %s587_s30 = sadd.s32 4294967295, %s881_s29   ;;  %s35_s6 = sadd.s32 1, %s877_s28  ;;  %s881_s29 = sphi %s941_s29, %s23_s29   ;;  %s877_s28 = sphi %s939_s28, %s1190_s28   ;;  %s873_s0 = sphi %s937_s0, %s1189_s0   ;;  %s869_s27 = sphi %s935_s27, %s1188_s27   ;;  %s865_s26 = sphi %s933_s26, %s1187_s26   ;;  %s861_s25 = sphi %s931_s25, %s1186_s25   ;;  %s857_s24 = sphi %s929_s24, %s1185_s24   ;;  %s853_s23 = sphi %s927_s23, %s1184_s23   ;;  %s849_s22 = sphi %s925_s22, %s1183_s22   ;;  %s845_s21 = sphi %s923_s21, %s1182_s21   ;;  %s841_s20 = sphi %s921_s20, %s1181_s20  }
   0xe   : > { %s63_s7 = sadd.s32 1, %s861_s25  ;;  %p70_p0 = scmp.ne.s32.totalorder %s861_s25, %s857_s24 }
   0xf   : > { %p71_p1 = scmp.eq.s32.totalorder %s881_s29, 0  ;;  %p76_p2 = scmp.ne.s32.totalorder %s857_s24, %s853_s23 }
  0x10   : > { %p981_p3 = scmp.eq.s32.totalorder %s587_s30, 0  ;;  %p618_p5 = scmp.lt.s32.totalorder %s881_s29, 4 }
  0x11   : > { %p72_p4 = por %p71_p1, %p70_p0  ;;  %s202_s10 = sand.u32 1, %s861_s25  }
  0x12   : > { %p990_p6 = por %p981_p3, %p76_p2  ;;  %s591_s11 = sshll.u32 %s202_s10, 3 }
  0x13   : > { %s592_s12 = sshll.u32 %s877_s28, 3  ;;  %s1174_s1 = sld [smem:[#allocation15_spill]] }
  0x14   : > { %s206_s16 = scalar_lea.vmem [#allocation8], %s591_s11  ;;  %p612_p7 = pnand %p618_p5, %p72_p4 }
  0x15   : > { %s214_s17 = sshll.u32 %s206_s16, 4  ;;  %p595_p8 = scmp.ge.s32.totalorder %s881_s29, 1  ;;  %s215_s17 = int_to_ptr.vmem [resolvable:$true] %s214_s17 }
  0x16   : > { %p238_p9 = scmp.lt.s32.totalorder %s881_s29, 5  ;;  %s203_s19 = scalar_lea.sflag [#allocation9], %s202_s10 }
  0x17   : > { %s32_s30 = sadd.s32 1, %s873_s0  ;;  %s89_s11 = sadd.s32 1, %s849_s22 }
  0x18   : > { %p1003_p10 = pnand %p595_p8, %p238_p9  ;;  %p33_p11 = scmp.ge.s32.totalorder %s32_s30, 2 }
  0x19   : > { %s210_s15 = scalar_lea.hbm %s1174_s1, %s592_s12  ;;  %p96_p12 = scmp.ne.s32.totalorder %s849_s22, %s845_s21 }
  0x1a   : > { %s212_s18 = sshll.u32 %s210_s15, 4  ;;  %p102_p13 = scmp.ne.s32.totalorder %s845_s21, %s841_s20  ;;  %s213_s18 = int_to_ptr.hbm [resolvable:$true] %s212_s18 }
  0x1b   : > { %614 = dma.hbm_to_vmem [thread:$0]  (!%p612_p7), %s213_s18, 128, %s215_s17, %s203_s19  }
  0x1c   : > { %s221_s12 = sand.u32 1, %s849_s22   ;;  %s1192_s30 = smov (%p33_p11, %s32_s30), 0 }
  0x1d   : > { %1176 = sst [smem:[#allocation14_spill]] %s1192_s30  ;;  %s1194_s6 = smov (!%p33_p11, %s35_s6), %s877_s28 }
  0x1e   : > { %s86_s10 = ssub.s32 %s873_s0, %s1192_s30  ;;  %p1023_p0 = por %p96_p12, %p71_p1 }
  0x1f   : > { %p37_p2 = scmp.ge.s32.totalorder %s1194_s6, 2  ;;  %p87_p4 = scmp.eq.s32.totalorder %s86_s10, 0 }
  0x20   : > { %p1029_p7 = por %p102_p13, %p981_p3  ;;  %s593_s16 = sshll.u32 %s221_s12, 3 }
  0x21   : > { %s1196_s6 = smov (%p37_p2, %s1194_s6), 0  ;;  %s594_s17 = sshll.u32 %s873_s0, 3 }
  0x22   : > { %s1036_s14 = scalar_select %p87_p4, %s849_s22, %s89_s11  }
  0x23   : > { %s60_s15 = ssub.s32 %s877_s28, %s1196_s6  ;;  %s225_s18 = scalar_lea.vmem [#allocation10], %s593_s16 }
  0x24   : > { %p61_p1 = scmp.eq.s32.totalorder %s60_s15, 0  ;;  %s233_s19 = sshll.u32 %s225_s18, 4  ;;  %s234_s19 = int_to_ptr.vmem [resolvable:$true] %s233_s19 }
  0x25   : > { %s229_s30 = scalar_lea.hbm %s1164_s2, %s594_s17  ;;  %p615_p3 = pnand %p618_p5, %p1023_p0 }
  0x26   : > { %s1044_s1 = scalar_select %p61_p1, %s861_s25, %s63_s7  }
  0x27   : > { %s231_s4 = sshll.u32 %s229_s30, 4  ;;  %s222_s11 = scalar_lea.sflag [#allocation11], %s221_s12  ;;  %s232_s4 = int_to_ptr.hbm [resolvable:$true] %s231_s4 }
  0x28   : > { %617 = dma.hbm_to_vmem [thread:$0]  (!%p615_p3), %s232_s4, 128, %s234_s19, %s222_s11  }
  0x29   : > { %242 = sbr.rel (%p1003_p10) target bundleno = 767 (0x2ff), region = 32  ;;  %s244_s15 = sand.u32 (!%p1003_p10), 1, %s857_s24  }
  0x2a   : > { %s596_s7 = sshll.u32 (!%p1003_p10), %s244_s15, 3  ;;  %s245_s16 = scalar_lea.sflag (!%p1003_p10), [#allocation9], %s244_s15 }
  0x2b   : > { %s248_s18 = scalar_lea.vmem (!%p1003_p10), [#allocation8], %s596_s7 }
  0x2e   : > { %832 = dma.done.wait (%p990_p6), %s245_s16, 128  }
  0x2f   : > { %834 = vsyncadd (%p990_p6), %s245_s16, 4294967168  ;;  %s254_s30 = sand.u32 1, %s845_s21  }
  0x30   : > { %s597_s13 = sshll.u32 %s254_s30, 3  ;;  %s255_s12 = scalar_lea.sflag [#allocation11], %s254_s30 }
  0x31   : > { %s258_s4 = scalar_lea.vmem [#allocation10], %s597_s13 }
  0x32   : > { %836 = dma.done.wait (%p1029_p7), %s255_s12, 128  }
  0x33   : > { %838 = vsyncadd (%p1029_p7), %s255_s12, 4294967168  ;;  %p294_p5 = scmp.lt.s32.totalorder %s869_s27, 1  ;;  %vm305_vm0 = vcmask 261120   ;;  %v1077_v0 = vld [vmem:[%s258_s4] sm:$0xff]  ;;  %v1081_v1 = vld [vmem:[%s248_s18] sm:$0xff]  ;;  %p334_p6 = scmp.eq.s32.totalorder %s865_s26, 0 }
  0x34   : > { %600 = vmatpush.xpose.msk.msra.mxu0 %vm305_vm0, %v1077_v0  ;;  %s1086_s20 = sld [smem:[#allocation7]]  ;;  %p602_p8 = scmp.ne.s32.totalorder %s865_s26, 0 }
  0x35   : > { %s295_s23 = scalar_select %p294_p5, %s869_s27, 1 }
  0x37   : > { %s598_s17 = sshll.u32 %s295_s23, 3  ;;  %601 = vmatmul.msk.f32.vlgmr.msra.gmra.mxu0 %vm305_vm0, %v1081_v1 }
  0x38   : > { %s1070_s10 = scalar_lea.vmem %s1165_s3, %s598_s17  ;;  %s1075_s15 = scalar_lea.vmem %s1167_s5, %s598_s17 }
  0x3a   : > { %v332_v2 = vstv %s1086_s20 }
  0xb1   : > { %337 = sbr.rel (%p602_p8) target bundleno = 185 (0xb9), region = 44 }
  0xb4   : > { %v329_v3 = vpop.f32.mrf.mxu0 }
  0xb5   : > { %v333_v4 = vmul.f32 %v332_v2, %v329_v3 }
  0xb6   : > { %vm338_vm1 = vcmask 7168   ;;  %v883_v5 = vmov -inf   ;;  %v884_v6 = vmov 0.0  }
  0xb7   : > { %339 = vst.msk [vmem:[#allocation2] sm:$0xff] %vm338_vm1, %v883_v5 }
  0xb8   : > { %340 = vst.msk [vmem:[#allocation3] sm:$0xff] %vm338_vm1, %v884_v6 }
  0xb9 PF: > { %vm342_vm2 = vcmask 64512   ;;  %v885_v8 = vmov 0   ;;  %vm364_vm3 = vcmask 7168   ;;  %p367_p9 = scmp.eq.s32.totalorder %s869_s27, 0 }
  0xba   : > { %v343_v7 = vsel %vm342_vm2, %v333_v4, -inf  ;;  %712 = vset.pattern.permute.xlu0 %v885_v8 }
  0xbb   : > { %344 = vmax.xlane.f32.xlu0 %v343_v7  ;;  %p368_p10 = pnand %p367_p9, %p334_p6 }
  0xbe   : > { %v341_v9 = vld [vmem:[#allocation2] sm:$0xff] }
  0xbf   : > { %v347_v20 = vld [vmem:[#allocation3] sm:$0xff] }
 0x12e   : > { %v345_v10 = vpop.xlane.xlu0 %344 }
 0x12f   : > { %v346_v11 = vmax.f32 %v341_v9, %v345_v10 }
 0x131   : > { %v348_v12 = vsub.f32 %v341_v9, %v346_v11  ;;  %366 = vst.msk [vmem:[#allocation2] sm:$0xff] %vm364_vm3, %v346_v11  ;;  %354 = vperm.xlu0 %712, %v346_v11  }
 0x133   : > { %v349_v18 = vmul.f32 1.442695, %v348_v12 }
 0x1a3   : > { %v355_v13 = vpop.permute.xlu0 %354 }
 0x1a4   : > { %v357_v14 = vsub.f32 %v333_v4, %v355_v13 }
 0x1a6   : > { %v358_v15 = vmul.f32 1.442695, %v357_v14 }
 0x1a8   : > { %713 = vpow2.f32 %v358_v15 }
 0x1a9   : > { %715 = vpow2.f32 %v349_v18 }
 0x1ae   : > { %v714_v16 = vpop.eup %713 }
 0x1af   : > { %v360_v17 = vsel %vm342_vm2, %v714_v16, 0.0  ;;  %v716_v19 = vpop.eup %715 }
 0x1b0   : > { %361 = vadd.xlane.f32.xlu1 %v360_v17  ;;  %v351_v21 = vmul.f32 %v716_v19, %v347_v20 }
 0x222   : > { %371 = sbr.rel (%p368_p10) target bundleno = 556 (0x22c), region = 48 }
 0x223   : > { %v362_v22 = vpop.xlane.xlu1 %361 }
 0x224   : > { %v363_v23 = vadd.f32 %v362_v22, %v351_v21 }
 0x226   : > { %365 = vst.msk [vmem:[#allocation3] sm:$0xff] %vm364_vm3, %v363_v23 }
 0x227   : > { %vm372_vm4 = vcmask 57344   ;;  %v886_v24 = vmov -inf   ;;  %v887_v25 = vmov 0.0  }
 0x228   : > { %373 = vst.msk [vmem:[#allocation4] sm:$0x1] %vm372_vm4, %v886_v24 }
 0x229   : > { %374 = vst.msk [vmem:[#allocation4 + $0x1] sm:$0x1] %vm372_vm4, %v886_v24 }
 0x22a   : > { %375 = vst.msk [vmem:[#allocation5] sm:$0x1] %vm372_vm4, %v887_v25 }
 0x22b   : > { %376 = vst.msk [vmem:[#allocation5 + $0x1] sm:$0x1] %vm372_vm4, %v887_v25 }
 0x22c PF: > { %v379_v26 = vrot.slane %v343_v7, 4  ;;  %s377_s7 = scalar_lea.vmem [#allocation4], %s865_s26  ;;  %vm406_vm5 = vcmask 57344   ;;  %s386_s16 = scalar_lea.vmem [#allocation5], %s865_s26 }
 0x22d   : > { %p603_p11 = scmp.ne.s32.totalorder %s869_s27, %s865_s26 }
 0x22e   : > { %v380_v27 = vmax.f32 %v343_v7, %v379_v26 }
 0x230   : > { %v381_v28 = vrot.slane %v380_v27, 2  ;;  %v378_v31 = vld [vmem:[%s377_s7] sm:$0x1] }
 0x232   : > { %v382_v29 = vmax.f32 %v380_v27, %v381_v28  ;;  %v387_v45 = vld [vmem:[%s386_s16] sm:$0x1] }
 0x234   : > { %v383_v30 = vrot.slane %v382_v29, 1 }
 0x236   : > { %v384_v32 = vmax.f32 %v382_v29, %v383_v30 }
 0x238   : > { %v385_v33 = vmax.f32 %v378_v31, %v384_v32 }
 0x23a   : > { %v393_v34 = vperm.slane %v385_v33, 0  ;;  %408 = vst.msk [vmem:[%s377_s7] sm:$0x1] %vm406_vm5, %v385_v33  ;;  %v388_v37 = vsub.f32 %v378_v31, %v385_v33 }
 0x23c   : > { %v395_v35 = vsub.f32 %v333_v4, %v393_v34  ;;  %v389_v38 = vmul.f32 1.442695, %v388_v37 }
 0x23e   : > { %v396_v36 = vmul.f32 1.442695, %v395_v35 }
 0x240   : > { %717 = vpow2.f32 %v396_v36 }
 0x241   : > { %719 = vpow2.f32 %v389_v38 }
 0x246   : > { %v718_v39 = vpop.eup %717 }
 0x247   : > { %v398_v40 = vsel %vm342_vm2, %v718_v39, 0.0  ;;  %v720_v44 = vpop.eup %719 }
 0x248   : > { %v399_v41 = vrot.slane %v398_v40, 4  ;;  %v391_v47 = vmul.f32 %v720_v44, %v387_v45 }
 0x24a   : > { %v400_v42 = vadd.f32 %v399_v41, %v398_v40 }
 0x24c   : > { %v401_v43 = vrot.slane %v400_v42, 2 }
 0x24e   : > { %v402_v46 = vadd.f32 %v401_v43, %v400_v42 }
 0x250   : > { %v403_v48 = vrot.slane %v402_v46, 1 }
 0x252   : > { %v404_v49 = vadd.f32 %v403_v48, %v402_v46  ;;  %412 = sbr.rel (%p603_p11) target bundleno = 722 (0x2d2), region = 52 }
 0x254   : > { %v405_v50 = vadd.f32 %v404_v49, %v391_v47 }
 0x256   : > { %407 = vst.msk [vmem:[%s386_s16] sm:$0x1] %vm406_vm5, %v405_v50 }
 0x257   : > { %v413_v51 = vmul.f32 %v1077_v0, %v1081_v1 }
 0x259   : > { %v414_v52 = vsel %vm305_vm0, %v413_v51, 0.0 }
 0x25a   : > { %415 = vadd.xlane.f32.xlu0 %v414_v52 }
 0x2cd   : > { %v416_v53 = vpop.xlane.xlu0 %415 }
 0x2ce   : > { %v417_v54 = vmul.f32 %v416_v53, %v332_v2 }
 0x2d0   : > { %418 = vst.msk [vmem:[#allocation6] sm:$0xff] %vm364_vm3, %v417_v54 }
 0x2d1   : > { %419 = vst.msk [vmem:[%s1075_s15] sm:$0xff] %vm364_vm3, %v417_v54 }
 0x2d2 PF: > { %p420_p12 = scmp.eq.s32.totalorder %s865_s26, 1  ;;  %p604_p13 = scmp.ne.s32.totalorder %s865_s26, 1 }
 0x2d4   : > { %423 = sbr.rel (%p604_p13) target bundleno = 744 (0x2e8), region = 56 }
 0x2d9   : > { %v425_v55 = vld [vmem:[#allocation3] sm:$0xff]  ;;  %v424_v57 = vld [vmem:[#allocation2] sm:$0xff]  ;;  %v429_v59 = vld [vmem:[#allocation6] sm:$0xff] }
 0x2da   : > { %721 = vlog2.f32 %v425_v55 }
 0x2e0   : > { %v722_v56 = vpop.eup %721 }
 0x2e1   : > { %v427_v58 = vmul.f32 0.6931472, %v722_v56 }
 0x2e3   : > { %v428_v60 = vadd.f32 %v427_v58, %v424_v57 }
 0x2e5   : > { %v430_v61 = vsub.f32 %v428_v60, %v429_v59 }
 0x2e7   : > { %431 = vst.msk [vmem:[%s1070_s10] sm:$0xff] %vm364_vm3, %v430_v61 }
 0x2e8 PF: > { %p432_p0 = scmp.eq.s32.totalorder %s869_s27, 1 }
 0x2ea   : > { %p433_p2 = pnand %p432_p0, %p420_p12 }
 0x2eb   : > { %s1179_s13 = sld [smem:[#allocation16_spill]] (!%p433_p2) }
 0x2ec   : > { %436 = sbr.rel (%p433_p2) target bundleno = 767 (0x2ff), region = 60 }
 0x2f1   : > { %v439_v62 = vld [vmem:[#allocation5] sm:$0x1]  ;;  %v440_v63 = vld [vmem:[#allocation5 + $0x1] sm:$0x1]  ;;  %v437_v1 = vld [vmem:[#allocation4] sm:$0x1] }
 0x2f2   : > { %723 = vlog2.f32 %v439_v62  ;;  %v438_v4 = vld [vmem:[#allocation4 + $0x1] sm:$0x1] }
 0x2f3   : > { %725 = vlog2.f32 %v440_v63 }
 0x2f8   : > { %v724_v0 = vpop.eup %723 }
 0x2f9   : > { %v726_v2 = vpop.eup %725  ;;  %v442_v3 = vmul.f32 0.6931472, %v724_v0 }
 0x2fa   : > { %v444_v5 = vmul.f32 0.6931472, %v726_v2 }
 0x2fb   : > { %v445_v6 = vadd.f32 %v442_v3, %v437_v1 }
 0x2fc   : > { %v446_v7 = vadd.f32 %v444_v5, %v438_v4 }
 0x2fd   : > { %447 = vst.msk [vmem:[%s1179_s13] sm:$0x1] %vm406_vm5, %v445_v6 }
 0x2fe   : > { %448 = vst.msk [vmem:[%s1179_s13 + $0x1] sm:$0x1] %vm406_vm5, %v446_v7 }
 0x2ff PF: > { %s23_s29 = sadd.s32 1, %s881_s29   ;;  %s1180_s12 = sld [smem:[#allocation14_spill]] }
 0x300   : > { %p20_p4 = scmp.ge.s32.totalorder %s23_s29, 6   ;;  %s1181_s20 = smov %s845_s21 }
 0x301   : > { %s1182_s21 = smov %s849_s22  ;;  %s1183_s22 = smov %s1036_s14 }
 0x302   : > { %s1184_s23 = smov %s857_s24  ;;  %s1185_s24 = smov %s861_s25 }
 0x303   : > { %s1186_s25 = smov %s1044_s1  ;;  %s1187_s26 = smov %s873_s0 }
 0x304   : > { %s1188_s27 = smov %s877_s28  ;;  %s1190_s28 = smov %s1196_s6 }
 0x305   : > { %s1189_s0 = smov %s1180_s12  ;;  %22 = sbr.rel (!%p20_p4) target bundleno = 13 (0xd), region = 127 }
 0x30a   :  { %488 = vsyncpa [#allocation9], 1 }
 0x30b   :  { %490 = vsyncpa [#allocation9 + $0x1], 1 }
 0x30c   :  { %491 = vsyncpa [#allocation11], 1 }
 0x30d   :  { %493 = vsyncpa [#allocation11 + $0x1], 1 }

</bundles_post_ra>
